<compile_context>
chip_gen: v5e
topology: v5e:2x2
jax: 0.10.0
libtpu: 0.0.40
codegen_flags: <defaults>
</compile_context>

<pallas_src>
import jax
import jax.numpy as jnp
from jax import lax
from jax.experimental import pallas as pl
from jax.experimental.pallas import tpu as pltpu


# ----------------------------- chip / tiling helpers -------------------------
def _vmem_capacity_bytes():
    try:
        return int(pltpu.get_tpu_info().vmem_capacity_bytes)
    except Exception:
        return 64 * 1024 * 1024            # conservative floor (v7x per-core)


def _vmem_limit(nbytes, cap):
    want = int(nbytes * 1.4) + (4 << 20)   # slack for double buffering
    hi = int(cap * 0.75)                   # never request close to physical
    return int(max(min(want, hi), min(32 << 20, hi)))


def _pick_tile(dim, preferred, align):
    """Largest preferred tile dividing `dim` with the given alignment,
    else the full extent (always a legal block shape)."""
    for t in preferred:
        if t <= dim and dim % t == 0 and t % align == 0:
            return t
    return dim


# ----------------------------- Kernel 1: QKV projection ----------------------
def _qkv_proj_kernel(x_ref, wq_ref, wk_ref, wv_ref, bq_ref, bk_ref, bv_ref,
                     q_ref, k_ref, v_ref):
    x = x_ref[...]                                     # bf16 [tm, H]
    q_ref[...] = (jnp.dot(x, wq_ref[...], preferred_element_type=jnp.float32)
                  + bq_ref[...]).astype(q_ref.dtype)
    k_ref[...] = (jnp.dot(x, wk_ref[...], preferred_element_type=jnp.float32)
                  + bk_ref[...]).astype(k_ref.dtype)
    v_ref[...] = (jnp.dot(x, wv_ref[...], preferred_element_type=jnp.float32)
                  + bv_ref[...]).astype(v_ref.dtype)


def qkv_projection(x, wq, wk, wv, bq, bk, bv, out_dtype=jnp.bfloat16):
    S, H = x.shape
    N = wq.shape[1]                                    # per-output width (NH*D)
    cap = _vmem_capacity_bytes()
    budget = int(cap * 0.6)
    out_bytes = jnp.dtype(out_dtype).itemsize

    def est(tm_, tn_):
        return (2 * tm_ * H * x.dtype.itemsize         # x (double buffered)
                + 2 * 3 * H * tn_ * wq.dtype.itemsize  # wq/wk/wv (bf16)
                + 2 * 3 * tn_ * 4                      # biases
                + 2 * 3 * tm_ * tn_ * out_bytes)       # q/k/v outputs

    # Prefer the widest N tile whose (resident) weights fit the budget.
    tn = None
    for cand in [N] + [c for c in (2048, 1024, 512, 256, 128) if c < N]:
        if (N % cand == 0 and (cand % 128 == 0 or cand == N)
                and 2 * 3 * H * cand * wq.dtype.itemsize <= budget // 2):
            tn = cand
            break
    if tn is None:
        tn = _pick_tile(N, (256, 128), 128)

    tm = None
    for cand in (512, 256, 128, 64, 32, 16, 8):
        if cand <= S and S % cand == 0 and est(cand, tn) <= budget:
            tm = cand
            break
    if tm is None:
        tm = _pick_tile(S, (256, 128, 64, 32, 16, 8), 8)

    # Grid order (N-tile, S-tile): S axis innermost -> weight/bias blocks
    # (index (0, j)) stay resident across all row tiles.
    grid = (N // tn, S // tm)
    x_spec = pl.BlockSpec((tm, H), lambda j, i: (i, 0))
    w_spec = pl.BlockSpec((H, tn), lambda j, i: (0, j))
    b_spec = pl.BlockSpec((1, tn), lambda j, i: (0, j))
    o_spec = pl.BlockSpec((tm, tn), lambda j, i: (i, j))

    out_sds = jax.ShapeDtypeStruct((S, N), out_dtype)
    return pl.pallas_call(
        _qkv_proj_kernel,
        out_shape=(out_sds, out_sds, out_sds),
        grid_spec=pltpu.PrefetchScalarGridSpec(
            num_scalar_prefetch=0,
            grid=grid,
            in_specs=[x_spec, w_spec, w_spec, w_spec, b_spec, b_spec, b_spec],
            out_specs=(o_spec, o_spec, o_spec)),
        compiler_params=pltpu.CompilerParams(
            dimension_semantics=("parallel", "parallel"),
            vmem_limit_bytes=_vmem_limit(est(tm, tn), cap)),
    )(x, wq, wk, wv, bq, bk, bv)


# ----------------------------- Kernel 2: attention ---------------------------
def _heads_per_block(num_heads, head_dim):
    """Smallest head group whose packed lane width is a multiple of 128,
    else all heads (full array extent is always a legal block width)."""
    for hb in range(1, num_heads + 1):
        if num_heads % hb == 0 and (hb * head_dim) % 128 == 0:
            return hb
    return num_heads


def _make_resident_attn_kernel(hb, head_dim):
    """K/V fully resident in VMEM: plain one-shot softmax per head,
    single lane-dense output store per tile."""
    def kernel(q_ref, k_ref, v_ref, o_ref):
        outs = []
        for h in range(hb):                                    # static unroll
            sl = slice(h * head_dim, (h + 1) * head_dim)
            q = q_ref[:, sl]                                   # bf16 [tq, D]
            k = k_ref[:, sl]                                   # bf16 [S,  D]
            v = v_ref[:, sl]
            s = lax.dot_general(q, k, (((1,), (1,)), ((), ())),
                                preferred_element_type=jnp.float32)   # [tq,S]
            m = jnp.max(s, axis=-1, keepdims=True)
            p = jnp.exp(s - m)
            l = jnp.sum(p, axis=-1, keepdims=True)
            o = lax.dot_general(p.astype(jnp.bfloat16), v,
                                (((1,), (0,)), ((), ())),
                                preferred_element_type=jnp.float32)   # [tq,D]
            outs.append(o * pl.reciprocal(l, approx=True))     # EUP vrcp
        o_ref[...] = jnp.concatenate(outs, axis=-1).astype(o_ref.dtype)
    return kernel


def _make_flash_attn_kernel(hb, head_dim):
    """Online-softmax over kv tiles; m/l scratch lane-replicated to 128."""
    def kernel(q_ref, k_ref, v_ref, o_ref, m_ref, l_ref, acc_ref):
        kv_i = pl.program_id(2)

        @pl.when(kv_i == 0)
        def _init():
            m_ref[...] = jnp.full(m_ref.shape, -jnp.inf, dtype=m_ref.dtype)
            l_ref[...] = jnp.zeros_like(l_ref)
            acc_ref[...] = jnp.zeros_like(acc_ref)

        for h in range(hb):                                    # static unroll
            sl = slice(h * head_dim, (h + 1) * head_dim)
            q = q_ref[:, sl]                                   # bf16 (scaled)
            k = k_ref[:, sl]
            v = v_ref[:, sl]
            s = lax.dot_general(q, k, (((1,), (1,)), ((), ())),
                                preferred_element_type=jnp.float32)  # [tq,tkv]
            m_prev = m_ref[h]                                  # [tq, 128]
            m_new = jnp.maximum(m_prev, jnp.max(s, axis=-1, keepdims=True))
            alpha = jnp.exp(m_prev - m_new)                    # [tq, 128]
            p = jnp.exp(s - m_new[:, 0:1])                     # [tq, tkv]
            l_ref[h] = alpha * l_ref[h] + jnp.sum(p, axis=-1, keepdims=True)
            acc_ref[h] = alpha[:, 0:1] * acc_ref[h] + lax.dot_general(
                p.astype(jnp.bfloat16), v, (((1,), (0,)), ((), ())),
                preferred_element_type=jnp.float32)
            m_ref[h] = m_new

        @pl.when(kv_i == pl.num_programs(2) - 1)
        def _finalize():
            outs = []
            for h in range(hb):
                inv = pl.reciprocal(l_ref[h][:, 0:1], approx=True)
                outs.append(acc_ref[h] * inv)
            o_ref[...] = jnp.concatenate(outs, axis=-1).astype(o_ref.dtype)
    return kernel


def mha_attention(q, k, v, num_heads, head_dim, out_dtype,
                  q_tile_override=None, kv_tile_override=None,
                  max_kv_resident_bytes=None):
    S, HQ = q.shape
    assert HQ == num_heads * head_dim
    hb = _heads_per_block(num_heads, head_dim)
    hbd = hb * head_dim
    n_hb = num_heads // hb
    cap = _vmem_capacity_bytes()
    budget = int(cap * 0.5)
    if max_kv_resident_bytes is None:
        max_kv_resident_bytes = int(cap * 0.35)
    out_bytes = jnp.dtype(out_dtype).itemsize

    tq = q_tile_override if q_tile_override is not None else \
        _pick_tile(S, (512, 256, 128, 64, 32, 16, 8), 8)
    assert S % tq == 0

    def resident_est(tq_):
        return (2 * 2 * S * hbd * 2               # K, V resident blocks
                + 2 * tq_ * hbd * 2                # q tile
                + 2 * tq_ * hbd * out_bytes        # out tile
                + 2 * 4 * tq_ * S)                 # scores / probs f32

    use_resident = (kv_tile_override is None
                    and resident_est(tq) <= min(budget, max_kv_resident_bytes))

    if use_resident:
        # kv grid axis removed: K/V blocks depend only on the head block and
        # stay resident across all q tiles (i is the innermost grid axis).
        grid = (n_hb, S // tq)
        q_spec = pl.BlockSpec((tq, hbd), lambda h, i: (i, h))
        kv_spec = pl.BlockSpec((S, hbd), lambda h, i: (0, h))
        o_spec = pl.BlockSpec((tq, hbd), lambda h, i: (i, h))
        return pl.pallas_call(
            _make_resident_attn_kernel(hb, head_dim),
            out_shape=jax.ShapeDtypeStruct((S, HQ), out_dtype),
            grid_spec=pltpu.PrefetchScalarGridSpec(
                num_scalar_prefetch=0,
                grid=grid,
                in_specs=[q_spec, kv_spec, kv_spec],
                out_specs=o_spec),
            compiler_params=pltpu.CompilerParams(
                dimension_semantics=("parallel", "parallel"),
                vmem_limit_bytes=_vmem_limit(resident_est(tq), cap)),
        )(q, k, v)

    # ----- flash-style fallback: kv reduction axis last ("arbitrary") -------
    def flash_est(tq_, tkv_):
        return (2 * tq_ * hbd * 2
                + 2 * 2 * tkv_ * hbd * 2
                + 2 * tq_ * hbd * out_bytes
                + 2 * hb * tq_ * 128 * 4           # m, l scratch
                + hb * tq_ * head_dim * 4          # acc scratch
                + 2 * 4 * tq_ * tkv_)              # scores / probs f32

    if kv_tile_override is not None:
        tkv = kv_tile_override
    else:
        tkv = None
        for cand in (2048, 1024, 512, 256, 128, 64, 32, 16, 8):
            if cand <= S and S % cand == 0 and flash_est(tq, cand) <= budget:
                tkv = cand
                break
        if tkv is None:
            tkv = _pick_tile(S, (128, 64, 32, 16, 8), 8)
    assert S % tkv == 0

    grid = (n_hb, S // tq, S // tkv)
    q_spec = pl.BlockSpec((tq, hbd), lambda h, i, j: (i, h))
    kv_spec = pl.BlockSpec((tkv, hbd), lambda h, i, j: (j, h))
    o_spec = pl.BlockSpec((tq, hbd), lambda h, i, j: (i, h))
    return pl.pallas_call(
        _make_flash_attn_kernel(hb, head_dim),
        out_shape=jax.ShapeDtypeStruct((S, HQ), out_dtype),
        grid_spec=pltpu.PrefetchScalarGridSpec(
            num_scalar_prefetch=0,
            grid=grid,
            in_specs=[q_spec, kv_spec, kv_spec],
            out_specs=o_spec,
            scratch_shapes=[
                pltpu.VMEM((hb, tq, 128), jnp.float32),       # running max m
                pltpu.VMEM((hb, tq, 128), jnp.float32),       # running sum l
                pltpu.VMEM((hb, tq, head_dim), jnp.float32),  # f32 accumulator
            ]),
        compiler_params=pltpu.CompilerParams(
            dimension_semantics=("parallel", "parallel", "arbitrary"),
            vmem_limit_bytes=_vmem_limit(flash_est(tq, tkv), cap)),
    )(q, k, v)


# ----------------------------- Module wrapper --------------------------------
class XLMRobertaSelfAttentionPallas:
    def __init__(self, hidden_size, num_heads, key):
        assert hidden_size % num_heads == 0
        self.hidden_size = hidden_size
        self.num_heads = num_heads
        self.num_kv_heads = num_heads
        self.head_dim = hidden_size // num_heads
        self.q_size = self.num_heads * self.head_dim
        self.kv_size = self.num_kv_heads * self.head_dim
        self.scaling = self.head_dim ** (-0.5)

        k1, k2 = jax.random.split(key)
        out_dim = self.q_size + 2 * self.kv_size
        # QKVParallelLinear: fused weight [3H, H], bias [3H] (torch layout).
        self.w_fused = jax.random.normal(k1, (out_dim, hidden_size),
                                         jnp.float32) * 0.02
        self.b_fused = jax.random.normal(k2, (out_dim,), jnp.float32) * 0.02

        wt = self.w_fused.T                                    # [H, 3H]
        qs, ks = self.q_size, self.kv_size
        # Fold the softmax scale into the Q projection (exact in f32; the
        # bf16 cast rounds either way).  Weights stored bf16 for the MXU.
        self.wq = (wt[:, :qs] * self.scaling).astype(jnp.bfloat16)
        self.wk = wt[:, qs:qs + ks].astype(jnp.bfloat16)
        self.wv = wt[:, qs + ks:].astype(jnp.bfloat16)
        self.bq = (self.b_fused[:qs] * self.scaling).reshape(1, -1)
        self.bk = self.b_fused[qs:qs + ks].reshape(1, -1)
        self.bv = self.b_fused[qs + ks:].reshape(1, -1)

    def __call__(self, hidden_states, q_tile_override=None,
                 kv_tile_override=None, max_kv_resident_bytes=None):
        # bf16 activations end-to-end (cast once); all accumulation in f32.
        x = hidden_states.astype(jnp.bfloat16)
        q, k, v = qkv_projection(x, self.wq, self.wk, self.wv,
                                 self.bq, self.bk, self.bv,
                                 out_dtype=jnp.bfloat16)
        return mha_attention(q, k, v, self.num_heads, self.head_dim,
                             out_dtype=hidden_states.dtype,
                             q_tile_override=q_tile_override,
                             kv_tile_override=kv_tile_override,
                             max_kv_resident_bytes=max_kv_resident_bytes)


# ----------------------------- Reference (plain JAX, f32) --------------------
def reference_forward(mod, x):
    """Original-module semantics: unscaled fused QKV + explicit score scale."""
    w = mod.w_fused.astype(jnp.float32)            # [3H, H]
    b = mod.b_fused.astype(jnp.float32)
    qkv = x.astype(jnp.float32) @ w.T + b
    qs, ks = mod.q_size, mod.kv_size
    q, k, v = qkv[:, :qs], qkv[:, qs:qs + ks], qkv[:, qs + ks:]
    S = x.shape[0]
    NH, D = mod.num_heads, mod.head_dim
    qh = q.reshape(S, NH, D).transpose(1, 0, 2)
    kh = k.reshape(S, NH, D).transpose(1, 0, 2)
    vh = v.reshape(S, NH, D).transpose(1, 0, 2)
    scores = jnp.einsum("hqd,hkd->hqk", qh, kh) * mod.scaling
    p = jax.nn.softmax(scores, axis=-1)
    o = jnp.einsum("hqk,hkd->hqd", p, vh)
    return o.transpose(1, 0, 2).reshape(S, NH * D).astype(x.dtype)


if __name__ == "__main__":
    key = jax.random.PRNGKey(0)
    k_param, k_x, k_param2, k_x2 = jax.random.split(key, 4)

    # -- Test 1: small shapes -> K/V-resident single-pass softmax path -------
    hidden_size, num_heads, seq_len = 32, 4, 8
    mod = XLMRobertaSelfAttentionPallas(hidden_size, num_heads, k_param)
    x = jax.random.normal(k_x, (seq_len, hidden_size), jnp.float32)
    out = jax.block_until_ready(mod(x))
    ref = reference_forward(mod, x)
    assert out.shape == (seq_len, hidden_size)
    assert out.dtype == x.dtype
    # bf16 MXU weights/activations + approx reciprocal -> loosened tolerance.
    assert jnp.allclose(out, ref, atol=3e-2, rtol=3e-2), "test1 mismatch"

    # -- Test 2: exercise the flash (online-softmax) fallback path -----------
    hidden_size2, num_heads2, seq_len2 = 256, 8, 256
    mod2 = XLMRobertaSelfAttentionPallas(hidden_size2, num_heads2, k_param2)
    x2 = jax.random.normal(k_x2, (seq_len2, hidden_size2), jnp.float32)
    out2 = jax.block_until_ready(
        mod2(x2, q_tile_override=128, kv_tile_override=64,
             max_kv_resident_bytes=0))
    ref2 = reference_forward(mod2, x2)
    assert out2.shape == (seq_len2, hidden_size2)
    assert out2.dtype == x2.dtype
    assert jnp.allclose(out2, ref2, atol=3e-2, rtol=3e-2), "test2 mismatch"

    print("KERNEL_OK")
</pallas_src>

<mosaic_0001>
module attributes {stable_mosaic.version = 11 : i64} {
  func.func @_qkv_proj_kernel(%arg0: i32, %arg1: i32, %arg2: memref<8x32xbf16, #tpu.memory_space<vmem>>, %arg3: memref<32x32xbf16, #tpu.memory_space<vmem>>, %arg4: memref<32x32xbf16, #tpu.memory_space<vmem>>, %arg5: memref<32x32xbf16, #tpu.memory_space<vmem>>, %arg6: memref<1x32xf32, #tpu.memory_space<vmem>>, %arg7: memref<1x32xf32, #tpu.memory_space<vmem>>, %arg8: memref<1x32xf32, #tpu.memory_space<vmem>>, %arg9: memref<8x32xbf16, #tpu.memory_space<vmem>>, %arg10: memref<8x32xbf16, #tpu.memory_space<vmem>>, %arg11: memref<8x32xbf16, #tpu.memory_space<vmem>>) attributes {dimension_semantics = [#tpu.dimension_semantics<parallel>, #tpu.dimension_semantics<parallel>], iteration_bounds = array<i64: 1, 1>, scalar_prefetch = 0 : i64, scratch_operands = 0 : i64, tpu.core_type = #tpu.core_type<tc>, window_params = [{transform_indices = @transform_0, window_bounds = array<i64: 8, 32>}, {transform_indices = @transform_1, window_bounds = array<i64: 32, 32>}, {transform_indices = @transform_2, window_bounds = array<i64: 32, 32>}, {transform_indices = @transform_3, window_bounds = array<i64: 32, 32>}, {transform_indices = @transform_4, window_bounds = array<i64: 1, 32>}, {transform_indices = @transform_5, window_bounds = array<i64: 1, 32>}, {transform_indices = @transform_6, window_bounds = array<i64: 1, 32>}, {transform_indices = @transform_7, window_bounds = array<i64: 8, 32>}, {transform_indices = @transform_8, window_bounds = array<i64: 8, 32>}, {transform_indices = @transform_9, window_bounds = array<i64: 8, 32>}]} {
    %c0 = arith.constant 0 : index
    %c0_0 = arith.constant 0 : index
    %0 = vector.load %arg2[%c0, %c0_0] : memref<8x32xbf16, #tpu.memory_space<vmem>>, vector<8x32xbf16>
    %c0_1 = arith.constant 0 : index
    %c0_2 = arith.constant 0 : index
    %1 = vector.load %arg3[%c0_1, %c0_2] : memref<32x32xbf16, #tpu.memory_space<vmem>>, vector<32x32xbf16>
    %cst = arith.constant dense<0.000000e+00> : vector<8x32xf32>
    %2 = tpu.matmul %0, %1, %cst {dimension_numbers = #tpu.dot_dimension_numbers<[1], [0], [0], [1], [0, 0, 1, 1], [], []>} : vector<8x32xbf16>, vector<32x32xbf16>, vector<8x32xf32> -> vector<8x32xf32>
    %c0_3 = arith.constant 0 : index
    %c0_4 = arith.constant 0 : index
    %3 = vector.load %arg6[%c0_3, %c0_4] : memref<1x32xf32, #tpu.memory_space<vmem>>, vector<1x32xf32>
    %4 = vector.broadcast %3 : vector<1x32xf32> to vector<8x32xf32>
    %5 = arith.addf %2, %4 : vector<8x32xf32>
    %6 = arith.truncf %5 : vector<8x32xf32> to vector<8x32xbf16>
    %c0_5 = arith.constant 0 : index
    %c0_6 = arith.constant 0 : index
    %7 = vector.load %arg9[%c0_5, %c0_6] : memref<8x32xbf16, #tpu.memory_space<vmem>>, vector<8x32xbf16>
    tpu.vector_store %arg9[%c0_5, %c0_6], %6 {strides = array<i32>} : memref<8x32xbf16, #tpu.memory_space<vmem>>, vector<8x32xbf16>,
    %c0_7 = arith.constant 0 : index
    %c0_8 = arith.constant 0 : index
    %8 = vector.load %arg4[%c0_7, %c0_8] : memref<32x32xbf16, #tpu.memory_space<vmem>>, vector<32x32xbf16>
    %cst_9 = arith.constant dense<0.000000e+00> : vector<8x32xf32>
    %9 = tpu.matmul %0, %8, %cst_9 {dimension_numbers = #tpu.dot_dimension_numbers<[1], [0], [0], [1], [0, 0, 1, 1], [], []>} : vector<8x32xbf16>, vector<32x32xbf16>, vector<8x32xf32> -> vector<8x32xf32>
    %c0_10 = arith.constant 0 : index
    %c0_11 = arith.constant 0 : index
    %10 = vector.load %arg7[%c0_10, %c0_11] : memref<1x32xf32, #tpu.memory_space<vmem>>, vector<1x32xf32>
    %11 = vector.broadcast %10 : vector<1x32xf32> to vector<8x32xf32>
    %12 = arith.addf %9, %11 : vector<8x32xf32>
    %13 = arith.truncf %12 : vector<8x32xf32> to vector<8x32xbf16>
    %c0_12 = arith.constant 0 : index
    %c0_13 = arith.constant 0 : index
    %14 = vector.load %arg10[%c0_12, %c0_13] : memref<8x32xbf16, #tpu.memory_space<vmem>>, vector<8x32xbf16>
    tpu.vector_store %arg10[%c0_12, %c0_13], %13 {strides = array<i32>} : memref<8x32xbf16, #tpu.memory_space<vmem>>, vector<8x32xbf16>,
    %c0_14 = arith.constant 0 : index
    %c0_15 = arith.constant 0 : index
    %15 = vector.load %arg5[%c0_14, %c0_15] : memref<32x32xbf16, #tpu.memory_space<vmem>>, vector<32x32xbf16>
    %cst_16 = arith.constant dense<0.000000e+00> : vector<8x32xf32>
    %16 = tpu.matmul %0, %15, %cst_16 {dimension_numbers = #tpu.dot_dimension_numbers<[1], [0], [0], [1], [0, 0, 1, 1], [], []>} : vector<8x32xbf16>, vector<32x32xbf16>, vector<8x32xf32> -> vector<8x32xf32>
    %c0_17 = arith.constant 0 : index
    %c0_18 = arith.constant 0 : index
    %17 = vector.load %arg8[%c0_17, %c0_18] : memref<1x32xf32, #tpu.memory_space<vmem>>, vector<1x32xf32>
    %18 = vector.broadcast %17 : vector<1x32xf32> to vector<8x32xf32>
    %19 = arith.addf %16, %18 : vector<8x32xf32>
    %20 = arith.truncf %19 : vector<8x32xf32> to vector<8x32xbf16>
    %c0_19 = arith.constant 0 : index
    %c0_20 = arith.constant 0 : index
    %21 = vector.load %arg11[%c0_19, %c0_20] : memref<8x32xbf16, #tpu.memory_space<vmem>>, vector<8x32xbf16>
    tpu.vector_store %arg11[%c0_19, %c0_20], %20 {strides = array<i32>} : memref<8x32xbf16, #tpu.memory_space<vmem>>, vector<8x32xbf16>,
    return
  }
  func.func @transform_0(%arg0: i32, %arg1: i32) -> (i32, i32) {
    %c0_i32 = arith.constant 0 : i32
    %c0_i32_0 = arith.constant 0 : i32
    return %arg1, %c0_i32 : i32, i32
  }
  func.func @transform_1(%arg0: i32, %arg1: i32) -> (i32, i32) {
    %c0_i32 = arith.constant 0 : i32
    %c0_i32_0 = arith.constant 0 : i32
    return %c0_i32, %arg0 : i32, i32
  }
  func.func @transform_2(%arg0: i32, %arg1: i32) -> (i32, i32) {
    %c0_i32 = arith.constant 0 : i32
    %c0_i32_0 = arith.constant 0 : i32
    return %c0_i32, %arg0 : i32, i32
  }
  func.func @transform_3(%arg0: i32, %arg1: i32) -> (i32, i32) {
    %c0_i32 = arith.constant 0 : i32
    %c0_i32_0 = arith.constant 0 : i32
    return %c0_i32, %arg0 : i32, i32
  }
  func.func @transform_4(%arg0: i32, %arg1: i32) -> (i32, i32) {
    %c0_i32 = arith.constant 0 : i32
    %c0_i32_0 = arith.constant 0 : i32
    return %c0_i32, %arg0 : i32, i32
  }
  func.func @transform_5(%arg0: i32, %arg1: i32) -> (i32, i32) {
    %c0_i32 = arith.constant 0 : i32
    %c0_i32_0 = arith.constant 0 : i32
    return %c0_i32, %arg0 : i32, i32
  }
  func.func @transform_6(%arg0: i32, %arg1: i32) -> (i32, i32) {
    %c0_i32 = arith.constant 0 : i32
    %c0_i32_0 = arith.constant 0 : i32
    return %c0_i32, %arg0 : i32, i32
  }
  func.func @transform_7(%arg0: i32, %arg1: i32) -> (i32, i32) {
    %c0_i32 = arith.constant 0 : i32
    return %arg1, %arg0 : i32, i32
  }
  func.func @transform_8(%arg0: i32, %arg1: i32) -> (i32, i32) {
    %c0_i32 = arith.constant 0 : i32
    return %arg1, %arg0 : i32, i32
  }
  func.func @transform_9(%arg0: i32, %arg1: i32) -> (i32, i32) {
    %c0_i32 = arith.constant 0 : i32
    return %arg1, %arg0 : i32, i32
  }
}

</mosaic_0001>

<bundles_post_ra>
// kernel: tpu_custom_call.1
= control target key start
LH: loop header
LB: loop body
LE: loop exit
PB: predicated region body
PF: predicated region fallthrough
CT: control target
= control target key end

     0   :  { %15 = vsyncpa [#allocation3], 0  ;;  %s569_s0 = inlined_call_operand.hbm [shape: bf16[8,32], index: 0, kind: input, shape index: {}]   ;;  %s570_s1 = inlined_call_operand.hbm [shape: bf16[32,32], index: 1, kind: input, shape index: {}]   ;;  %s571_s2 = inlined_call_operand.hbm [shape: bf16[32,32], index: 2, kind: input, shape index: {}]   ;;  %s572_s3 = inlined_call_operand.hbm [shape: bf16[32,32], index: 3, kind: input, shape index: {}]   ;;  %s573_s4 = inlined_call_operand.vmem [shape: f32[1,32], index: 4, kind: input, shape index: {}]   ;;  %s574_s5 = inlined_call_operand.vmem [shape: f32[1,32], index: 5, kind: input, shape index: {}]   ;;  %s575_s6 = inlined_call_operand.vmem [shape: f32[1,32], index: 6, kind: input, shape index: {}]   ;;  %s576_s7 = inlined_call_operand.hbm [shape: bf16[8,32], index: 7, kind: output, shape index: {0}]   ;;  %s577_s8 = inlined_call_operand.hbm [shape: bf16[8,32], index: 8, kind: output, shape index: {1}]   ;;  %s578_s9 = inlined_call_operand.hbm [shape: bf16[8,32], index: 9, kind: output, shape index: {2}]  }
   0x1   :  { %16 = vsyncpa [#allocation6], 0 }
   0x2   :  { %17 = vsyncpa [#allocation9], 0 }
   0x3   :  { %18 = vsyncpa [#allocation4], 0  ;;  %s35_s11 = sshll.u32 %s570_s1, 4  ;;  %s36_s11 = int_to_ptr.hbm [resolvable:$true] %s35_s11 }
   0x4   :  { %19 = vsyncpa [#allocation12], 0  ;;  %s477_s12 = smov [#allocation5]   ;;  %s25_s16 = sshll.u32 %s569_s0, 4  ;;  %s26_s16 = int_to_ptr.hbm [resolvable:$true] %s25_s16 }
   0x5   :  { %s37_s13 = sshll.u32 %s477_s12, 4  ;;  %s478_s17 = smov 64   ;;  %s38_s13 = int_to_ptr.vmem [resolvable:$true] %s37_s13 }
   0x6   :  { %s479_s18 = smov 4   ;;  %s480_s19 = smov [#allocation2]  }
   0x7   :  { %43 = dma.hbm_to_vmem [thread:$0]  %s36_s11, 256, %s38_s13, [#allocation6], %s478_s17, %s478_s17, %s479_s18  }
   0x8   :  { %s27_s20 = sshll.u32 %s480_s19, 4  ;;  %s48_s23 = sshll.u32 %s571_s2, 4  ;;  %s28_s20 = int_to_ptr.vmem [resolvable:$true] %s27_s20  ;;  %s49_s23 = int_to_ptr.hbm [resolvable:$true] %s48_s23 }
   0x9   :  { %30 = dma.hbm_to_vmem [thread:$0]  %s26_s16, 64, %s28_s20, [#allocation3]  }
   0xa   :  { %s61_s25 = sshll.u32 %s572_s3, 4  ;;  %s481_s26 = smov [#allocation7]   ;;  %s62_s25 = int_to_ptr.hbm [resolvable:$true] %s61_s25 }
   0xb   :  { %s50_s27 = sshll.u32 %s481_s26, 4  ;;  %s482_s0 = smov [#allocation8]   ;;  %s51_s27 = int_to_ptr.vmem [resolvable:$true] %s50_s27 }
   0xc   :  { %56 = dma.hbm_to_vmem [thread:$0]  %s49_s23, 256, %s51_s27, [#allocation6], %s478_s17, %s478_s17, %s479_s18  }
   0xd   :  { %s63_s28 = sshll.u32 %s482_s0, 4  ;;  %s64_s28 = int_to_ptr.vmem [resolvable:$true] %s63_s28 }
   0xe   :  { %69 = dma.hbm_to_vmem [thread:$0]  %s62_s25, 256, %s64_s28, [#allocation9], %s478_s17, %s478_s17, %s479_s18  }
   0xf   :  { %467 = dma.done.wait [#allocation3], 64  }
  0x10   :  { %468 = vsyncadd [#allocation3], 4294967232 }
  0x11   :  { %469 = dma.done.wait [#allocation6], 512  }
  0x12   :  { %470 = vsyncadd [#allocation6], 4294966784 }
  0x13   :  { %471 = dma.done.wait [#allocation9], 256  }
  0x14   :  { %472 = vsyncadd [#allocation9], 4294967040  ;;  %v282_v0 = vld [vmem:[#allocation5 + $0x8] sm:$0xff]  ;;  %v284_v1 = vld [vmem:[#allocation7 + $0x8] sm:$0xff]  ;;  %vm114_vm0 = vcmask 261120   ;;  %s483_s10 = smov [#allocation10]  }
  0x15   :  { %v286_v2 = vld [vmem:[#allocation8 + $0x8] sm:$0xff]  ;;  %124 = vmatpush.bf16.msra.mxu0 %v282_v0  ;;  %160 = vmatpush.bf16.msra.mxu1 %v284_v1  ;;  %v281_v3 = vld [vmem:[#allocation5] sm:$0xff]  ;;  %v283_v4 = vld [vmem:[#allocation7] sm:$0xff]  ;;  %s209_s11 = sshll.u32 %s483_s10, 4  ;;  %s211_s14 = sshll.u32 %s576_s7, 4  ;;  %vm132_vm1 = vcmask 257024   ;;  %s210_s11 = int_to_ptr.vmem [resolvable:$true] %s209_s11  ;;  %s212_s14 = int_to_ptr.hbm [resolvable:$true] %s211_s14 }
  0x16   :  { %195 = vmatpush.bf16.msra.mxu2 %v286_v2  ;;  %v285_v5 = vld [vmem:[#allocation8] sm:$0xff]  ;;  %v93_v6 = vld [vmem:[#allocation2] sm:$0xf]  ;;  %s484_s15 = smov [#allocation11]   ;;  %s485_s7 = smov [#allocation13]  }
  0x17   :  { %v296_v7 = vld [vmem:[%s573_s4] ss:$0 sm:$0xff]  ;;  %s220_s16 = sshll.u32 %s484_s15, 4  ;;  %s222_s4 = sshll.u32 %s577_s8, 4  ;;  %s221_s16 = int_to_ptr.vmem [resolvable:$true] %s220_s16  ;;  %s223_s4 = int_to_ptr.hbm [resolvable:$true] %s222_s4 }
  0x18   :  { %v297_v8 = vld [vmem:[%s574_s5] ss:$0 sm:$0xff]  ;;  %s231_s20 = sshll.u32 %s485_s7, 4  ;;  %s233_s23 = sshll.u32 %s578_s9, 4  ;;  %s232_s20 = int_to_ptr.vmem [resolvable:$true] %s231_s20  ;;  %s234_s23 = int_to_ptr.hbm [resolvable:$true] %s233_s23 }
  0x19   :  { %125 = vmatpush.bf16.msra.mxu0 %v281_v3  ;;  %161 = vmatpush.bf16.msra.mxu1 %v283_v4  ;;  %v298_v15 = vld [vmem:[%s575_s6] ss:$0 sm:$0xff] }
  0x1a   :  { %196 = vmatpush.bf16.msra.mxu2 %v285_v5 }
  0x1c   :  { %262 = vmatmul.msk.bf16.vlgmr.msra.gmra.mxu0 %vm114_vm0, %v93_v6  ;;  %271 = vmatmul.msk.bf16.vlgmr.msra.gmra.mxu1 %vm114_vm0, %v93_v6 }
  0x1d   :  { %280 = vmatmul.msk.bf16.vlgmr.msra.gmra.mxu2 %vm114_vm0, %v93_v6 }
  0x99   :  { %v127_v9 = vpop.f32.mrf.mxu0  ;;  %v163_v10 = vpop.f32.mrf.mxu1 }
  0x9a   :  { %v128_v11 = vadd.f32 %v296_v7, %v127_v9  ;;  %v164_v12 = vadd.f32 %v297_v8, %v163_v10 }
  0x9c   :  { %v131_v13 = vpack.c.bf16 %v128_v11, %v128_v11  ;;  %v167_v14 = vpack.c.bf16 %v164_v12, %v164_v12 }
  0x9e   :  { %133 = vst.msk [vmem:[#allocation10] sm:$0xf] %vm132_vm1, %v131_v13 }
  0x9f   :  { %168 = vst.msk [vmem:[#allocation11] sm:$0xf] %vm132_vm1, %v167_v14  ;;  %214 = dma.vmem_to_hbm [thread:$0]  %s210_s11, 64, %s212_s14, [#allocation4]  }
  0xa0   :  { %v198_v16 = vpop.f32.mrf.mxu2  ;;  %225 = dma.vmem_to_hbm [thread:$0]  %s221_s16, 64, %s223_s4, [#allocation12]  }
  0xa1   :  { %v199_v17 = vadd.f32 %v298_v15, %v198_v16  ;;  %v129_v18 = vpop.f32.mrf.mxu0  ;;  %v165_v19 = vpop.f32.mrf.mxu1 }
  0xa3   :  { %v202_v20 = vpack.c.bf16 %v199_v17, %v199_v17 }
  0xa5   :  { %203 = vst.msk [vmem:[#allocation13] sm:$0xf] %vm132_vm1, %v202_v20 }
  0xa6   :  { %236 = dma.vmem_to_hbm [thread:$0]  %s232_s20, 64, %s234_s23, [#allocation12]  }
  0xa8   :  { %v200_v21 = vpop.f32.mrf.mxu2 }
  0xa9   :  { %473 = dma.done.wait [#allocation4], 64  }
  0xaa   :  { %474 = vsyncadd [#allocation4], 4294967232 }
  0xab   :  { %475 = dma.done.wait [#allocation12], 128  }
  0xac   :  { %476 = vsyncadd [#allocation12], 4294967168 }
  0xad   :  { %249 = vsyncpa [#allocation3], 1 }
  0xae   :  { %250 = vsyncpa [#allocation6], 1 }
  0xaf   :  { %251 = vsyncpa [#allocation9], 1 }
  0xb0   :  { %252 = vsyncpa [#allocation4], 1 }
  0xb1   :  { %253 = vsyncpa [#allocation12], 1 }

</bundles_post_ra>
